<compile_context>
chip_gen: v7x
topology: tpu7x:2x2x1
jax: 0.10.0
libtpu: 0.0.40
codegen_flags: <defaults>
</compile_context>

<pallas_src>
import jax
import jax.numpy as jnp
from jax.experimental import pallas as pl
from jax.experimental.pallas import tpu as pltpu

INPUT_DIM = 12 * 12   # 144
THETA_DIM = 3
HIDDEN_DIM = 64
NUM_LAYERS = 5
NUM_CLASSES = 1
NUM_HIDDEN = NUM_LAYERS - 1   # 4 hidden Linear+ReLU blocks


def _round_up(n, m):
    return ((n + m - 1) // m) * m


def ratio_network_kernel(x_ref, th_ref, w1x_ref, w1t_ref, b1_ref,
                         wh_ref, bh_ref, w2_ref, b2_ref, out_ref):
    """x: (TB, 144) bf16, theta: (TB, 3) f32
       w1x: (144, H) bf16, w1t: (3, H) f32, b1: (1, H) f32
       wh: (L, H, H) bf16, bh: (L, 1, H) f32
       w2: (1, H) f32 (fc2 weight row), b2: (1, 1) f32
       out: (TB, 1) f32 = sigmoid(logit)
    """
    # fc1 x-part on the MXU: bf16 x bf16 -> f32 accumulation.
    h = jnp.dot(x_ref[...], w1x_ref[...], preferred_element_type=jnp.float32)
    # fc1 theta-part (K=3): VPU broadcast FMAs instead of a padded MXU pass.
    th = th_ref[...]
    w1t = w1t_ref[...]
    h = (h
         + th[:, 0:1] * w1t[0:1, :]
         + th[:, 1:2] * w1t[1:2, :]
         + th[:, 2:3] * w1t[2:3, :]
         + b1_ref[...])
    # Keep inter-layer activations in bf16 (single cast after bias + ReLU).
    h = jnp.maximum(h, 0.0).astype(jnp.bfloat16)

    # hidden_fcs: (num_layers - 1) x (Linear + ReLU), statically unrolled.
    for l in range(NUM_HIDDEN):
        h = jnp.dot(h, wh_ref[l], preferred_element_type=jnp.float32) + bh_ref[l]
        h = jnp.maximum(h, 0.0).astype(jnp.bfloat16)

    # fc2 (N=1): elementwise multiply + lane reduction (VPU/XLU) instead of a
    # degenerate 64x1 MXU matmul.
    logit = jnp.sum(h.astype(jnp.float32) * w2_ref[...],
                    axis=-1, keepdims=True) + b2_ref[...]
    out_ref[...] = jax.nn.sigmoid(logit)


def ratio_network_forward(x, theta, params, tile_b=1024, vmem_limit_bytes=None):
    """x: (B, 12, 12), theta: (B, 3) -> (B, 1) f32 probabilities."""
    w1x, w1t, b1, wh, bh, w2, b2 = params
    B = x.shape[0]

    # Flatten is a free row-major view; NO concat, NO pad -> no extra HBM
    # round trips.  x travels in bf16 (dominant HBM stream halved); in real
    # pipelines push this cast into the producer of x.
    xf = x.reshape(B, INPUT_DIM)
    if xf.dtype != jnp.bfloat16:
        xf = xf.astype(jnp.bfloat16)
    th = theta.astype(jnp.float32)

    # Batch tile: multiple of 8, capped at tile_b.  The grid uses cdiv so a
    # ragged tail is handled by Pallas edge-block masking (rows independent).
    tb = _round_up(min(tile_b, _round_up(B, 8)), 8)
    grid = (pl.cdiv(B, tb),)

    flops = 2 * B * (INPUT_DIM * HIDDEN_DIM + THETA_DIM * HIDDEN_DIM
                     + NUM_HIDDEN * HIDDEN_DIM * HIDDEN_DIM + HIDDEN_DIM)
    weight_bytes = (w1x.size * 2 + wh.size * 2
                    + (w1t.size + b1.size + bh.size + w2.size + b2.size) * 4)
    bytes_accessed = (B * (INPUT_DIM * 2 + THETA_DIM * 4 + NUM_CLASSES * 4)
                      + weight_bytes)

    out = pl.pallas_call(
        ratio_network_kernel,
        out_shape=jax.ShapeDtypeStruct((B, NUM_CLASSES), jnp.float32),
        grid=grid,
        in_specs=[
            # batch-tiled activations
            pl.BlockSpec((tb, INPUT_DIM), lambda i: (i, 0)),
            pl.BlockSpec((tb, THETA_DIM), lambda i: (i, 0)),
            # weights/biases: constant block index -> VMEM-resident across steps
            pl.BlockSpec((INPUT_DIM, HIDDEN_DIM), lambda i: (0, 0)),
            pl.BlockSpec((THETA_DIM, HIDDEN_DIM), lambda i: (0, 0)),
            pl.BlockSpec((1, HIDDEN_DIM), lambda i: (0, 0)),
            pl.BlockSpec((NUM_HIDDEN, HIDDEN_DIM, HIDDEN_DIM), lambda i: (0, 0, 0)),
            pl.BlockSpec((NUM_HIDDEN, 1, HIDDEN_DIM), lambda i: (0, 0, 0)),
            pl.BlockSpec((1, HIDDEN_DIM), lambda i: (0, 0)),
            pl.BlockSpec((1, NUM_CLASSES), lambda i: (0, 0)),
        ],
        out_specs=pl.BlockSpec((tb, NUM_CLASSES), lambda i: (i, 0)),
        compiler_params=pltpu.CompilerParams(
            dimension_semantics=("parallel",),
            vmem_limit_bytes=vmem_limit_bytes),
        cost_estimate=pl.CostEstimate(
            flops=flops, transcendentals=B, bytes_accessed=bytes_accessed),
    )(xf, th, w1x, w1t, b1, wh, bh, w2, b2)
    return out


def init_params(key):
    """Deterministic init mimicking nn.Linear default U[-1/sqrt(fan_in), +]."""
    def uniform(k, shape, fan_in):
        bound = 1.0 / jnp.sqrt(jnp.float32(fan_in))
        return jax.random.uniform(k, shape, jnp.float32, -bound, bound)

    keys = jax.random.split(key, 2 * (NUM_LAYERS + 1))
    fan1 = INPUT_DIM + THETA_DIM
    w1 = uniform(keys[0], (fan1, HIDDEN_DIM), fan1)          # (147, 64), (in, out)
    b1 = uniform(keys[1], (1, HIDDEN_DIM), fan1)
    w1x = w1[:INPUT_DIM].astype(jnp.bfloat16)                # (144, 64) bf16
    w1t = w1[INPUT_DIM:]                                      # (3, 64) f32

    wh_list, bh_list = [], []
    for i in range(NUM_HIDDEN):
        wh_list.append(uniform(keys[2 + 2 * i], (HIDDEN_DIM, HIDDEN_DIM), HIDDEN_DIM))
        bh_list.append(uniform(keys[3 + 2 * i], (1, HIDDEN_DIM), HIDDEN_DIM))
    wh = jnp.stack(wh_list, axis=0).astype(jnp.bfloat16)      # (L, H, H) bf16
    bh = jnp.stack(bh_list, axis=0)                           # (L, 1, H) f32

    w2 = uniform(keys[-2], (1, HIDDEN_DIM), HIDDEN_DIM)       # fc2 weight row (1, 64)
    b2 = uniform(keys[-1], (1, NUM_CLASSES), HIDDEN_DIM)      # (1, 1)
    return (w1x, w1t, b1, wh, bh, w2, b2)


def reference_forward(x, theta, params):
    """Pure-JAX reference using the same bf16-matmul / f32-accumulate recipe."""
    w1x, w1t, b1, wh, bh, w2, b2 = params
    B = x.shape[0]
    xf = x.reshape(B, INPUT_DIM).astype(jnp.bfloat16)
    h = jnp.dot(xf, w1x, preferred_element_type=jnp.float32)
    h = h + theta.astype(jnp.float32) @ w1t + b1
    h = jnp.maximum(h, 0.0).astype(jnp.bfloat16)
    for l in range(wh.shape[0]):
        h = jnp.dot(h, wh[l], preferred_element_type=jnp.float32) + bh[l]
        h = jnp.maximum(h, 0.0).astype(jnp.bfloat16)
    logit = jnp.sum(h.astype(jnp.float32) * w2, axis=-1, keepdims=True) + b2
    return jax.nn.sigmoid(logit)


if __name__ == "__main__":
    key = jax.random.PRNGKey(0)
    k_params, k_x, k_t, k_x2, k_t2 = jax.random.split(key, 5)

    params = init_params(k_params)

    # Small demo batch: a single (full) grid block.
    B = 8
    x = jax.random.normal(k_x, (B, 12, 12), dtype=jnp.float32)
    theta = jax.random.normal(k_t, (B, THETA_DIM), dtype=jnp.float32)
    out = jax.block_until_ready(ratio_network_forward(x, theta, params))
    ref = reference_forward(x, theta, params)
    assert out.shape == (B, NUM_CLASSES)
    assert bool(jnp.all(jnp.isfinite(out)))
    assert jnp.allclose(out, ref, atol=1e-3, rtol=1e-3), (out, ref)

    # Second check: multiple batch tiles plus a ragged tail block (203 is not
    # a multiple of 64, and the 11-row tail is not a multiple of 8), handled
    # entirely by Pallas edge-block masking -- no wrapper-side padding copy.
    B2 = 203
    x2 = jax.random.normal(k_x2, (B2, 12, 12), dtype=jnp.float32)
    theta2 = jax.random.normal(k_t2, (B2, THETA_DIM), dtype=jnp.float32)
    out2 = jax.block_until_ready(
        ratio_network_forward(x2, theta2, params, tile_b=64))
    ref2 = reference_forward(x2, theta2, params)
    assert out2.shape == (B2, NUM_CLASSES)
    assert bool(jnp.all(jnp.isfinite(out2)))
    assert jnp.allclose(out2, ref2, atol=1e-3, rtol=1e-3)

    print("KERNEL_OK")
</pallas_src>

<mosaic_0001>
module attributes {stable_mosaic.version = 11 : i64} {
  func.func @ratio_network_kernel(%arg0: i32, %arg1: memref<8x144xbf16, #tpu.memory_space<vmem>>, %arg2: memref<8x3xf32, #tpu.memory_space<vmem>>, %arg3: memref<144x64xbf16, #tpu.memory_space<vmem>>, %arg4: memref<3x64xf32, #tpu.memory_space<vmem>>, %arg5: memref<1x64xf32, #tpu.memory_space<vmem>>, %arg6: memref<4x64x64xbf16, #tpu.memory_space<vmem>>, %arg7: memref<4x1x64xf32, #tpu.memory_space<vmem>>, %arg8: memref<1x64xf32, #tpu.memory_space<vmem>>, %arg9: memref<1x1xf32, #tpu.memory_space<vmem>>, %arg10: memref<8x1xf32, #tpu.memory_space<vmem>>) attributes {dimension_semantics = [#tpu.dimension_semantics<parallel>], iteration_bounds = array<i64: 1>, scalar_prefetch = 0 : i64, scratch_operands = 0 : i64, tpu.core_type = #tpu.core_type<tc>, window_params = [{transform_indices = @transform_0, window_bounds = array<i64: 8, 144>}, {transform_indices = @transform_1, window_bounds = array<i64: 8, 3>}, {pipeline_mode = #tpu.pipeline_mode<synchronous>, transform_indices = @transform_2, window_bounds = array<i64: 144, 64>}, {pipeline_mode = #tpu.pipeline_mode<synchronous>, transform_indices = @transform_3, window_bounds = array<i64: 3, 64>}, {pipeline_mode = #tpu.pipeline_mode<synchronous>, transform_indices = @transform_4, window_bounds = array<i64: 1, 64>}, {pipeline_mode = #tpu.pipeline_mode<synchronous>, transform_indices = @transform_5, window_bounds = array<i64: 4, 64, 64>}, {pipeline_mode = #tpu.pipeline_mode<synchronous>, transform_indices = @transform_6, window_bounds = array<i64: 4, 1, 64>}, {pipeline_mode = #tpu.pipeline_mode<synchronous>, transform_indices = @transform_7, window_bounds = array<i64: 1, 64>}, {pipeline_mode = #tpu.pipeline_mode<synchronous>, transform_indices = @transform_8, window_bounds = array<i64: 1, 1>}, {transform_indices = @transform_9, window_bounds = array<i64: 8, 1>}]} {
    %c0 = arith.constant 0 : index
    %c0_0 = arith.constant 0 : index
    %0 = vector.load %arg1[%c0, %c0_0] : memref<8x144xbf16, #tpu.memory_space<vmem>>, vector<8x144xbf16>
    %c0_1 = arith.constant 0 : index
    %c0_2 = arith.constant 0 : index
    %1 = vector.load %arg3[%c0_1, %c0_2] : memref<144x64xbf16, #tpu.memory_space<vmem>>, vector<144x64xbf16>
    %cst = arith.constant dense<0.000000e+00> : vector<8x64xf32>
    %2 = tpu.matmul %0, %1, %cst {dimension_numbers = #tpu.dot_dimension_numbers<[1], [0], [0], [1], [0, 0, 1, 1], [], []>} : vector<8x144xbf16>, vector<144x64xbf16>, vector<8x64xf32> -> vector<8x64xf32>
    %c0_3 = arith.constant 0 : index
    %c0_4 = arith.constant 0 : index
    %3 = vector.load %arg2[%c0_3, %c0_4] : memref<8x3xf32, #tpu.memory_space<vmem>>, vector<8x3xf32>
    %c0_5 = arith.constant 0 : index
    %c0_6 = arith.constant 0 : index
    %4 = vector.load %arg4[%c0_5, %c0_6] : memref<3x64xf32, #tpu.memory_space<vmem>>, vector<3x64xf32>
    %5 = vector.extract_strided_slice %3 {offsets = [0, 0], sizes = [8, 1], strides = [1, 1]} : vector<8x3xf32> to vector<8x1xf32>
    %6 = vector.extract_strided_slice %4 {offsets = [0, 0], sizes = [1, 64], strides = [1, 1]} : vector<3x64xf32> to vector<1x64xf32>
    %7 = vector.broadcast %5 : vector<8x1xf32> to vector<8x64xf32>
    %8 = vector.broadcast %6 : vector<1x64xf32> to vector<8x64xf32>
    %9 = arith.mulf %7, %8 : vector<8x64xf32>
    %10 = arith.addf %2, %9 : vector<8x64xf32>
    %11 = vector.extract_strided_slice %3 {offsets = [0, 1], sizes = [8, 1], strides = [1, 1]} : vector<8x3xf32> to vector<8x1xf32>
    %12 = vector.extract_strided_slice %4 {offsets = [1, 0], sizes = [1, 64], strides = [1, 1]} : vector<3x64xf32> to vector<1x64xf32>
    %13 = vector.broadcast %11 : vector<8x1xf32> to vector<8x64xf32>
    %14 = vector.broadcast %12 : vector<1x64xf32> to vector<8x64xf32>
    %15 = arith.mulf %13, %14 : vector<8x64xf32>
    %16 = arith.addf %10, %15 : vector<8x64xf32>
    %17 = vector.extract_strided_slice %3 {offsets = [0, 2], sizes = [8, 1], strides = [1, 1]} : vector<8x3xf32> to vector<8x1xf32>
    %18 = vector.extract_strided_slice %4 {offsets = [2, 0], sizes = [1, 64], strides = [1, 1]} : vector<3x64xf32> to vector<1x64xf32>
    %19 = vector.broadcast %17 : vector<8x1xf32> to vector<8x64xf32>
    %20 = vector.broadcast %18 : vector<1x64xf32> to vector<8x64xf32>
    %21 = arith.mulf %19, %20 : vector<8x64xf32>
    %22 = arith.addf %16, %21 : vector<8x64xf32>
    %c0_7 = arith.constant 0 : index
    %c0_8 = arith.constant 0 : index
    %23 = vector.load %arg5[%c0_7, %c0_8] : memref<1x64xf32, #tpu.memory_space<vmem>>, vector<1x64xf32>
    %24 = vector.broadcast %23 : vector<1x64xf32> to vector<8x64xf32>
    %25 = arith.addf %22, %24 : vector<8x64xf32>
    %cst_9 = arith.constant 0.000000e+00 : f32
    %26 = vector.broadcast %cst_9 : f32 to vector<8x64xf32>
    %27 = arith.maximumf %25, %26 : vector<8x64xf32>
    %28 = arith.truncf %27 : vector<8x64xf32> to vector<8x64xbf16>
    %c0_10 = arith.constant 0 : index
    %c0_11 = arith.constant 0 : index
    %c0_12 = arith.constant 0 : index
    %29 = vector.load %arg6[%c0_10, %c0_11, %c0_12] : memref<4x64x64xbf16, #tpu.memory_space<vmem>>, vector<1x64x64xbf16>
    %30 = vector.shape_cast %29 : vector<1x64x64xbf16> to vector<64x64xbf16>
    %cst_13 = arith.constant dense<0.000000e+00> : vector<8x64xf32>
    %31 = tpu.matmul %28, %30, %cst_13 {dimension_numbers = #tpu.dot_dimension_numbers<[1], [0], [0], [1], [0, 0, 1, 1], [], []>} : vector<8x64xbf16>, vector<64x64xbf16>, vector<8x64xf32> -> vector<8x64xf32>
    %c0_14 = arith.constant 0 : index
    %c0_15 = arith.constant 0 : index
    %c0_16 = arith.constant 0 : index
    %32 = vector.load %arg7[%c0_14, %c0_15, %c0_16] : memref<4x1x64xf32, #tpu.memory_space<vmem>>, vector<1x1x64xf32>
    %33 = vector.shape_cast %32 : vector<1x1x64xf32> to vector<1x64xf32>
    %34 = vector.broadcast %33 : vector<1x64xf32> to vector<8x64xf32>
    %35 = arith.addf %31, %34 : vector<8x64xf32>
    %cst_17 = arith.constant 0.000000e+00 : f32
    %36 = vector.broadcast %cst_17 : f32 to vector<8x64xf32>
    %37 = arith.maximumf %35, %36 : vector<8x64xf32>
    %38 = arith.truncf %37 : vector<8x64xf32> to vector<8x64xbf16>
    %c1 = arith.constant 1 : index
    %c0_18 = arith.constant 0 : index
    %c0_19 = arith.constant 0 : index
    %39 = vector.load %arg6[%c1, %c0_18, %c0_19] : memref<4x64x64xbf16, #tpu.memory_space<vmem>>, vector<1x64x64xbf16>
    %40 = vector.shape_cast %39 : vector<1x64x64xbf16> to vector<64x64xbf16>
    %cst_20 = arith.constant dense<0.000000e+00> : vector<8x64xf32>
    %41 = tpu.matmul %38, %40, %cst_20 {dimension_numbers = #tpu.dot_dimension_numbers<[1], [0], [0], [1], [0, 0, 1, 1], [], []>} : vector<8x64xbf16>, vector<64x64xbf16>, vector<8x64xf32> -> vector<8x64xf32>
    %c1_21 = arith.constant 1 : index
    %c0_22 = arith.constant 0 : index
    %c0_23 = arith.constant 0 : index
    %42 = vector.load %arg7[%c1_21, %c0_22, %c0_23] : memref<4x1x64xf32, #tpu.memory_space<vmem>>, vector<1x1x64xf32>
    %43 = vector.shape_cast %42 : vector<1x1x64xf32> to vector<1x64xf32>
    %44 = vector.broadcast %43 : vector<1x64xf32> to vector<8x64xf32>
    %45 = arith.addf %41, %44 : vector<8x64xf32>
    %cst_24 = arith.constant 0.000000e+00 : f32
    %46 = vector.broadcast %cst_24 : f32 to vector<8x64xf32>
    %47 = arith.maximumf %45, %46 : vector<8x64xf32>
    %48 = arith.truncf %47 : vector<8x64xf32> to vector<8x64xbf16>
    %c2 = arith.constant 2 : index
    %c0_25 = arith.constant 0 : index
    %c0_26 = arith.constant 0 : index
    %49 = vector.load %arg6[%c2, %c0_25, %c0_26] : memref<4x64x64xbf16, #tpu.memory_space<vmem>>, vector<1x64x64xbf16>
    %50 = vector.shape_cast %49 : vector<1x64x64xbf16> to vector<64x64xbf16>
    %cst_27 = arith.constant dense<0.000000e+00> : vector<8x64xf32>
    %51 = tpu.matmul %48, %50, %cst_27 {dimension_numbers = #tpu.dot_dimension_numbers<[1], [0], [0], [1], [0, 0, 1, 1], [], []>} : vector<8x64xbf16>, vector<64x64xbf16>, vector<8x64xf32> -> vector<8x64xf32>
    %c2_28 = arith.constant 2 : index
    %c0_29 = arith.constant 0 : index
    %c0_30 = arith.constant 0 : index
    %52 = vector.load %arg7[%c2_28, %c0_29, %c0_30] : memref<4x1x64xf32, #tpu.memory_space<vmem>>, vector<1x1x64xf32>
    %53 = vector.shape_cast %52 : vector<1x1x64xf32> to vector<1x64xf32>
    %54 = vector.broadcast %53 : vector<1x64xf32> to vector<8x64xf32>
    %55 = arith.addf %51, %54 : vector<8x64xf32>
    %cst_31 = arith.constant 0.000000e+00 : f32
    %56 = vector.broadcast %cst_31 : f32 to vector<8x64xf32>
    %57 = arith.maximumf %55, %56 : vector<8x64xf32>
    %58 = arith.truncf %57 : vector<8x64xf32> to vector<8x64xbf16>
    %c3 = arith.constant 3 : index
    %c0_32 = arith.constant 0 : index
    %c0_33 = arith.constant 0 : index
    %59 = vector.load %arg6[%c3, %c0_32, %c0_33] : memref<4x64x64xbf16, #tpu.memory_space<vmem>>, vector<1x64x64xbf16>
    %60 = vector.shape_cast %59 : vector<1x64x64xbf16> to vector<64x64xbf16>
    %cst_34 = arith.constant dense<0.000000e+00> : vector<8x64xf32>
    %61 = tpu.matmul %58, %60, %cst_34 {dimension_numbers = #tpu.dot_dimension_numbers<[1], [0], [0], [1], [0, 0, 1, 1], [], []>} : vector<8x64xbf16>, vector<64x64xbf16>, vector<8x64xf32> -> vector<8x64xf32>
    %c3_35 = arith.constant 3 : index
    %c0_36 = arith.constant 0 : index
    %c0_37 = arith.constant 0 : index
    %62 = vector.load %arg7[%c3_35, %c0_36, %c0_37] : memref<4x1x64xf32, #tpu.memory_space<vmem>>, vector<1x1x64xf32>
    %63 = vector.shape_cast %62 : vector<1x1x64xf32> to vector<1x64xf32>
    %64 = vector.broadcast %63 : vector<1x64xf32> to vector<8x64xf32>
    %65 = arith.addf %61, %64 : vector<8x64xf32>
    %cst_38 = arith.constant 0.000000e+00 : f32
    %66 = vector.broadcast %cst_38 : f32 to vector<8x64xf32>
    %67 = arith.maximumf %65, %66 : vector<8x64xf32>
    %68 = arith.truncf %67 : vector<8x64xf32> to vector<8x64xbf16>
    %69 = arith.extf %68 : vector<8x64xbf16> to vector<8x64xf32>
    %c0_39 = arith.constant 0 : index
    %c0_40 = arith.constant 0 : index
    %70 = vector.load %arg8[%c0_39, %c0_40] : memref<1x64xf32, #tpu.memory_space<vmem>>, vector<1x64xf32>
    %71 = vector.broadcast %70 : vector<1x64xf32> to vector<8x64xf32>
    %72 = arith.mulf %69, %71 : vector<8x64xf32>
    %cst_41 = arith.constant dense<0.000000e+00> : vector<8xf32>
    %73 = vector.multi_reduction <add>, %72, %cst_41 [1] : vector<8x64xf32> to vector<8xf32>
    %74 = vector.shape_cast %73 : vector<8xf32> to vector<8x1xf32>
    %c0_42 = arith.constant 0 : index
    %c0_43 = arith.constant 0 : index
    %75 = vector.load %arg9[%c0_42, %c0_43] : memref<1x1xf32, #tpu.memory_space<vmem>>, vector<1x1xf32>
    %76 = vector.broadcast %75 : vector<1x1xf32> to vector<8x1xf32>
    %77 = arith.addf %74, %76 : vector<8x1xf32>
    %78 = arith.negf %77 : vector<8x1xf32>
    %79 = math.exp %78 : vector<8x1xf32>
    %cst_44 = arith.constant 1.000000e+00 : f32
    %80 = vector.broadcast %cst_44 : f32 to vector<8x1xf32>
    %81 = arith.addf %80, %79 : vector<8x1xf32>
    %82 = arith.divf %80, %81 : vector<8x1xf32>
    %c0_45 = arith.constant 0 : index
    %c0_46 = arith.constant 0 : index
    %83 = vector.load %arg10[%c0_45, %c0_46] : memref<8x1xf32, #tpu.memory_space<vmem>>, vector<8x1xf32>
    tpu.vector_store %arg10[%c0_45, %c0_46], %82 {strides = array<i32>} : memref<8x1xf32, #tpu.memory_space<vmem>>, vector<8x1xf32>,
    return
  }
  func.func @transform_0(%arg0: i32) -> (i32, i32) {
    %c0_i32 = arith.constant 0 : i32
    %c0_i32_0 = arith.constant 0 : i32
    return %arg0, %c0_i32 : i32, i32
  }
  func.func @transform_1(%arg0: i32) -> (i32, i32) {
    %c0_i32 = arith.constant 0 : i32
    %c0_i32_0 = arith.constant 0 : i32
    return %arg0, %c0_i32 : i32, i32
  }
  func.func @transform_2(%arg0: i32) -> (i32, i32) {
    %c0_i32 = arith.constant 0 : i32
    %c0_i32_0 = arith.constant 0 : i32
    %c0_i32_1 = arith.constant 0 : i32
    return %c0_i32, %c0_i32_0 : i32, i32
  }
  func.func @transform_3(%arg0: i32) -> (i32, i32) {
    %c0_i32 = arith.constant 0 : i32
    %c0_i32_0 = arith.constant 0 : i32
    %c0_i32_1 = arith.constant 0 : i32
    return %c0_i32, %c0_i32_0 : i32, i32
  }
  func.func @transform_4(%arg0: i32) -> (i32, i32) {
    %c0_i32 = arith.constant 0 : i32
    %c0_i32_0 = arith.constant 0 : i32
    %c0_i32_1 = arith.constant 0 : i32
    return %c0_i32, %c0_i32_0 : i32, i32
  }
  func.func @transform_5(%arg0: i32) -> (i32, i32, i32) {
    %c0_i32 = arith.constant 0 : i32
    %c0_i32_0 = arith.constant 0 : i32
    %c0_i32_1 = arith.constant 0 : i32
    %c0_i32_2 = arith.constant 0 : i32
    return %c0_i32, %c0_i32_0, %c0_i32_1 : i32, i32, i32
  }
  func.func @transform_6(%arg0: i32) -> (i32, i32, i32) {
    %c0_i32 = arith.constant 0 : i32
    %c0_i32_0 = arith.constant 0 : i32
    %c0_i32_1 = arith.constant 0 : i32
    %c0_i32_2 = arith.constant 0 : i32
    return %c0_i32, %c0_i32_0, %c0_i32_1 : i32, i32, i32
  }
  func.func @transform_7(%arg0: i32) -> (i32, i32) {
    %c0_i32 = arith.constant 0 : i32
    %c0_i32_0 = arith.constant 0 : i32
    %c0_i32_1 = arith.constant 0 : i32
    return %c0_i32, %c0_i32_0 : i32, i32
  }
  func.func @transform_8(%arg0: i32) -> (i32, i32) {
    %c0_i32 = arith.constant 0 : i32
    %c0_i32_0 = arith.constant 0 : i32
    %c0_i32_1 = arith.constant 0 : i32
    return %c0_i32, %c0_i32_0 : i32, i32
  }
  func.func @transform_9(%arg0: i32) -> (i32, i32) {
    %c0_i32 = arith.constant 0 : i32
    %c0_i32_0 = arith.constant 0 : i32
    return %arg0, %c0_i32 : i32, i32
  }
}

</mosaic_0001>

<bundles_post_ra>
// kernel: tpu_custom_call.1
= control target key start
LH: loop header
LB: loop body
LE: loop exit
PB: predicated region body
PF: predicated region fallthrough
CT: control target
= control target key end

     0   :  { %v750_v0 = vmov 0   ;;  %v751_v2 = vmov 2   ;;  %vm126_vm0 = vcmask 130048   ;;  %v752_v11 = vmov 0.0   ;;  %s942_s2 = inlined_call_operand.vmem [shape: bf16[144,64], index: 2, kind: input, shape index: {}]   ;;  %s943_s0 = inlined_call_operand.vmem [shape: bf16[8,144], index: 0, kind: input, shape index: {}]   ;;  %s944_s1 = inlined_call_operand.vmem [shape: f32[8,3], index: 1, kind: input, shape index: {}]   ;;  %s945_s5 = inlined_call_operand.vmem [shape: bf16[4,64,64], index: 5, kind: input, shape index: {}]   ;;  %s946_s3 = inlined_call_operand.vmem [shape: f32[3,64], index: 3, kind: input, shape index: {}]   ;;  %s947_s4 = inlined_call_operand.vmem [shape: f32[1,64], index: 4, kind: input, shape index: {}]   ;;  %s948_s6 = inlined_call_operand.vmem [shape: f32[4,1,64], index: 6, kind: input, shape index: {}]   ;;  %s949_s8 = inlined_call_operand.<no memory space> [shape: f32[1,1], index: 8, kind: input, shape index: {}]   ;;  %s950_s7 = inlined_call_operand.vmem [shape: f32[1,64], index: 7, kind: input, shape index: {}]   ;;  %s951_s9 = inlined_call_operand.vmem [shape: f32[8,1], index: 9, kind: output, shape index: {}]  }
   0x1   :  { %130 = vmatprep.subr.bf16.mxu0 %v750_v0  ;;  %v719_v1 = vld [vmem:[%s942_s2] sm:$0xff]   ;;  %715 = vset.pattern.permute.xlu0 %v750_v0  ;;  %v720_v3 = vld [vmem:[%s942_s2 + $0x8] sm:$0xff]   ;;  %v721_v4 = vld [vmem:[%s942_s2 + $0x10] sm:$0xff]   ;;  %v753_v12 = vmov 1   ;;  %vm754_vm1 = vmmov 0   ;;  %v61_v21 = vlaneseq  ;;  %vm239_vm2 = vcmask 523264  }
   0x2   :  { %717 = vset.pattern.permute.xlu1 %v751_v2  ;;  %131 = vmatpush1.bf16.msra.mxu0 %v719_v1  ;;  %v35_v5 = vld [vmem:[%s943_s0] sm:$0xff]  ;;  %v722_v7 = vld [vmem:[%s942_s2 + $0x18] sm:$0xff]   ;;  %v724_v13 = vld [vmem:[%s942_s2 + $0x28] sm:$0xff]   ;;  %vm569_vm3 = vcmask 7168  }
   0x3   :  { %132 = vmatprep.subr.bf16.mxu0 %v750_v0  ;;  %v54_v6 = vld [vmem:[%s944_s1] sm:$0xff]  ;;  %v576_v8 = vcombine.high %v35_v5, %v35_v5  ;;  %662 = vmatprep.subr.bf16.mxu1 %v752_v11  ;;  %v725_v14 = vld [vmem:[%s942_s2 + $0x30] sm:$0xff]   ;;  %v726_v15 = vld [vmem:[%s942_s2 + $0x38] sm:$0xff]   ;;  %v575_v17 = vcombine.low %v35_v5, %v35_v5  ;;  %v62_v22 = vshrl.u32 %v61_v21, 7 }
   0x4   :  { %58 = vperm.xlu0 %715, %v54_v6   ;;  %181 = vperm.xlu1 %717, %v54_v6   ;;  %v730_v9 = vld [vmem:[%s945_s5] sm:$0xff]   ;;  %v731_v18 = vld [vmem:[%s945_s5 + $0x8] sm:$0xff]   ;;  %v732_v19 = vld [vmem:[%s945_s5 + $0x10] sm:$0xff]  }
   0x5   :  { %v723_v10 = vld [vmem:[%s942_s2 + $0x20] sm:$0xff]   ;;  %586 = vmatprep.mubr.msk.bf16.mxu0 %vm126_vm0, %v576_v8  ;;  %663 = vmatpush3.bf16.msra.mxu1 %v730_v9  ;;  %v733_v20 = vld [vmem:[%s945_s5 + $0x18] sm:$0xff]   ;;  %v63_v24 = vsub.s32 0, %v62_v22  ;;  %v176_v25 = vsub.s32 1, %v62_v22  ;;  %v186_v27 = vsub.s32 2, %v62_v22  ;;  %v735_v48 = vld [vmem:[%s945_s5 + $0x28] sm:$0xff]  }
   0x6   :  { %133 = vmatpush1.bf16.msra.mxu0 %v720_v3  ;;  %664 = vmatprep.subr.bf16.mxu1 %v752_v11  ;;  %v727_v16 = vld [vmem:[%s942_s2 + $0x40] sm:$0xff]   ;;  %v736_v49 = vld [vmem:[%s945_s5 + $0x30] sm:$0xff]   ;;  %v737_v50 = vld [vmem:[%s945_s5 + $0x38] sm:$0xff]  }
   0x7   :  { %134 = vmatprep.subr.bf16.mxu0 %v750_v0  ;;  %670 = vmatprep.mubr.msk.bf16.mxu1 %vm754_vm1, %v752_v11  ;;  %v55_v26 = vld [vmem:[%s946_s3] sm:$0x7]  ;;  %v739_v60 = vld [vmem:[%s945_s5 + $0x48] sm:$0xff]   ;;  %v740_v61 = vld [vmem:[%s945_s5 + $0x50] sm:$0xff]  }
   0x8   :  { %716 = vset.pattern.permute.xlu0 %v753_v12  ;;  %v64_v28 = vrot.slane %v55_v26, %v63_v24  ;;  %v177_v29 = vrot.slane %v55_v26, %v176_v25  ;;  %v187_v31 = vrot.slane %v55_v26, %v186_v27  ;;  %v587_v42 = vld [vmem:[%s947_s4] ss:$0 sm:$0xff]  ;;  %v741_v62 = vld [vmem:[%s945_s5 + $0x58] sm:$0xff]   ;;  %v603_v1 = vld [vmem:[%s948_s6 + $0x1] ss:$0 sm:$0xff] }
   0x9   :  { %171 = vperm.xlu0 %716, %v54_v6   ;;  %665 = vmatpush3.bf16.msra.mxu1 %v731_v18  ;;  %v734_v46 = vld [vmem:[%s945_s5 + $0x20] sm:$0xff]   ;;  %v744_v9 = vld [vmem:[%s945_s5 + $0x70] sm:$0xff]  }
   0xa   :  { %135 = vmatpush1.bf16.msra.mxu0 %v721_v4  ;;  %666 = vmatprep.subr.bf16.mxu1 %v752_v11  ;;  %v588_v51 = vld [vmem:[%s948_s6] ss:$0 sm:$0xff]  ;;  %v618_v12 = vld [vmem:[%s948_s6 + $0x2] ss:$0 sm:$0xff] }
   0xb   :  { %136 = vmatprep.subr.bf16.mxu0 %v750_v0  ;;  %v738_v58 = vld [vmem:[%s945_s5 + $0x40] sm:$0xff]  }
   0xc   :  { %v742_v63 = vld [vmem:[%s945_s5 + $0x60] sm:$0xff]  }
   0xd   :  { %718 = vset.pattern.permute.xlu0 %v751_v2  ;;  %667 = vmatpush3.bf16.msra.mxu1 %v732_v19 }
   0xe   :  { %137 = vmatpush1.bf16.msra.mxu0 %v722_v7  ;;  %668 = vmatprep.subr.bf16.mxu1 %v752_v11 }
   0xf   :  { %138 = vmatprep.subr.bf16.mxu0 %v750_v0 }
  0x11   :  { %669 = vmatpush3.bf16.msra.mxu1 %v733_v20  ;;  %v633_v20 = vld [vmem:[%s948_s6 + $0x3] ss:$0 sm:$0xff] }
  0x12   :  { %139 = vmatpush1.bf16.msra.mxu0 %v723_v10  ;;  %674 = vmatprep.subr.bf16.mxu1 %v752_v11  ;;  %v745_v10 = vld [vmem:[%s945_s5 + $0x78] sm:$0xff]  }
  0x13   :  { %140 = vmatprep.subr.bf16.mxu0 %v750_v0 }
  0x16   :  { %141 = vmatpush1.bf16.msra.mxu0 %v724_v13 }
  0x17   :  { %142 = vmatprep.subr.bf16.mxu0 %v750_v0 }
  0x1a   :  { %143 = vmatpush1.bf16.msra.mxu0 %v725_v14 }
  0x1b   :  { %144 = vmatprep.subr.bf16.mxu0 %v750_v0 }
  0x1e   :  { %145 = vmatpush1.bf16.msra.mxu0 %v726_v15 }
  0x1f   :  { %146 = vmatprep.subr.bf16.mxu0 %v750_v0  ;;  %v743_v0 = vld [vmem:[%s945_s5 + $0x68] sm:$0xff]  }
  0x22   :  { %147 = vmatpush1.bf16.msra.mxu0 %v727_v16 }
  0x23   :  { %698 = vmatprep.subr.bf16.mxu0 %v752_v11 }
  0x25   :  { %163 = vmatmul.mubr.bf16.vlgmr.msra.gmra.mrb[0].mxu0 %v575_v17 }
  0x26   :  { %706 = vmatprep.mubr.msk.bf16.mxu0 %vm754_vm1, %v752_v11  ;;  %699 = vmatpush3.bf16.msra.mxu0 %v742_v63 }
  0x27   :  { %700 = vmatprep.subr.bf16.mxu0 %v752_v11 }
  0x2a   :  { %701 = vmatpush3.bf16.msra.mxu0 %v743_v0 }
  0x2b   :  { %702 = vmatprep.subr.bf16.mxu0 %v752_v11 }
  0x2e   :  { %703 = vmatpush3.bf16.msra.mxu0 %v744_v9 }
  0x2f   :  { %704 = vmatprep.subr.bf16.mxu0 %v752_v11 }
  0x32   :  { %705 = vmatpush3.bf16.msra.mxu0 %v745_v10 }
  0x83   :  { %v59_v23 = vpop.permute.xlu0 %58  ;;  %v182_v32 = vpop.permute.xlu1 %181 }
  0x84   :  { %v65_v33 = vmul.f32 %v64_v28, %v59_v23  ;;  %v188_v38 = vmul.f32 %v187_v31, %v182_v32  ;;  %v639_v28 = vld [vmem:[%s950_s7] ss:$0 sm:$0xff] }
  0x88   :  { %v172_v30 = vpop.permute.xlu0 %171 }
  0x89   :  { %v178_v34 = vmul.f32 %v177_v29, %v172_v30 }
  0xf8   :  { %v164_v35 = vpop.f32.mrb[0].mxu0 }
  0xf9   :  { %v165_v36 = vadd.f32 %v164_v35, %v65_v33  ;;  %v166_v37 = vpop.f32.mrb[1].mxu0 }
  0xfa   :  { %v167_v39 = vpop.f32.mrb[2].mxu0 }
  0xfb   :  { %v179_v40 = vadd.f32 %v178_v34, %v165_v36  ;;  %v168_v41 = vpop.f32.mrb[3].mxu0 }
  0xfd   :  { %v189_v43 = vadd.f32 %v188_v38, %v179_v40 }
  0xff   :  { %v197_v44 = vadd.f32 %v587_v42, %v189_v43 }
 0x101   :  { %v198_v45 = vmax.f32 %v197_v44, 0.0 }
 0x103   :  { %v199_v47 = vpack.c.bf16 %v198_v45, %v198_v45 }
 0x105   :  { %671 = vmatmul.mubr.msk.bf16.vlgmr.msra.gmra.mrb[0].mxu1 %vm239_vm2, %v199_v47 }
 0x106   :  { %675 = vmatpush3.bf16.msra.mxu1 %v734_v46  ;;  %682 = vmatprep.mubr.msk.bf16.mxu1 %vm754_vm1, %v752_v11 }
 0x107   :  { %676 = vmatprep.subr.bf16.mxu1 %v752_v11 }
 0x10a   :  { %677 = vmatpush3.bf16.msra.mxu1 %v735_v48 }
 0x10b   :  { %678 = vmatprep.subr.bf16.mxu1 %v752_v11 }
 0x10e   :  { %679 = vmatpush3.bf16.msra.mxu1 %v736_v49 }
 0x10f   :  { %680 = vmatprep.subr.bf16.mxu1 %v752_v11 }
 0x112   :  { %681 = vmatpush3.bf16.msra.mxu1 %v737_v50 }
 0x113   :  { %686 = vmatprep.subr.bf16.mxu1 %v752_v11 }
 0x1d8   :  { %v277_v52 = vpop.f32.mrb[0].mxu1 }
 0x1d9   :  { %v278_v53 = vadd.f32 %v588_v51, %v277_v52  ;;  %v672_v54 = vpop.f32.mrb[1].mxu1 }
 0x1da   :  { %v280_v55 = vpop.f32.mrb[2].mxu1 }
 0x1db   :  { %v283_v56 = vmax.f32 %v278_v53, 0.0  ;;  %v673_v57 = vpop.f32.mrb[3].mxu1 }
 0x1dd   :  { %v284_v59 = vpack.c.bf16 %v283_v56, %v283_v56 }
 0x1df   :  { %683 = vmatmul.mubr.msk.bf16.vlgmr.msra.gmra.mrb[4].mxu1 %vm239_vm2, %v284_v59 }
 0x1e0   :  { %687 = vmatpush3.bf16.msra.mxu1 %v738_v58  ;;  %694 = vmatprep.mubr.msk.bf16.mxu1 %vm754_vm1, %v752_v11 }
 0x1e1   :  { %688 = vmatprep.subr.bf16.mxu1 %v752_v11 }
 0x1e4   :  { %689 = vmatpush3.bf16.msra.mxu1 %v739_v60 }
 0x1e5   :  { %690 = vmatprep.subr.bf16.mxu1 %v752_v11 }
 0x1e8   :  { %691 = vmatpush3.bf16.msra.mxu1 %v740_v61 }
 0x1e9   :  { %692 = vmatprep.subr.bf16.mxu1 %v752_v11  ;;  %v14_v11 = vstv %s949_s8 }
 0x1ea   :  { %15 = vst [vmem:[#allocation2] sm:$0x1] %v14_v11 }
 0x1ec   :  { %693 = vmatpush3.bf16.msra.mxu1 %v741_v62 }
 0x1f1   :  { %v640_v32 = vld [vmem:[#allocation2] ss:$0 sm:$0xff] }
 0x2b2   :  { %v363_v2 = vpop.f32.mrb[4].mxu1 }
 0x2b3   :  { %v364_v3 = vadd.f32 %v603_v1, %v363_v2  ;;  %v684_v4 = vpop.f32.mrb[5].mxu1 }
 0x2b4   :  { %v366_v5 = vpop.f32.mrb[6].mxu1 }
 0x2b5   :  { %v369_v6 = vmax.f32 %v364_v3, 0.0  ;;  %v685_v7 = vpop.f32.mrb[7].mxu1 }
 0x2b7   :  { %v370_v8 = vpack.c.bf16 %v369_v6, %v369_v6 }
 0x2b9   :  { %695 = vmatmul.mubr.msk.bf16.vlgmr.msra.gmra.mrb[8].mxu1 %vm239_vm2, %v370_v8 }
 0x38c   :  { %v449_v13 = vpop.f32.mrb[8].mxu1 }
 0x38d   :  { %v450_v14 = vadd.f32 %v618_v12, %v449_v13  ;;  %v696_v15 = vpop.f32.mrb[9].mxu1 }
 0x38e   :  { %v452_v16 = vpop.f32.mrb[10].mxu1 }
 0x38f   :  { %v455_v17 = vmax.f32 %v450_v14, 0.0  ;;  %v697_v18 = vpop.f32.mrb[11].mxu1 }
 0x391   :  { %v456_v19 = vpack.c.bf16 %v455_v17, %v455_v17 }
 0x393   :  { %707 = vmatmul.mubr.msk.bf16.vlgmr.msra.gmra.mrb[4].mxu0 %vm239_vm2, %v456_v19 }
 0x466   :  { %v535_v21 = vpop.f32.mrb[4].mxu0 }
 0x467   :  { %v536_v22 = vadd.f32 %v633_v20, %v535_v21  ;;  %v708_v23 = vpop.f32.mrb[5].mxu0 }
 0x468   :  { %v538_v24 = vpop.f32.mrb[6].mxu0 }
 0x469   :  { %v541_v25 = vmax.f32 %v536_v22, 0.0  ;;  %v709_v26 = vpop.f32.mrb[7].mxu0 }
 0x46b   :  { %v542_v27 = vpack.c.bf16 %v541_v25, %v541_v25 }
 0x46d   :  { %v543_v29 = vunpack.c.l.bf16 %v542_v27 }
 0x46f   :  { %v551_v30 = vmul.f32 %v639_v28, %v543_v29 }
 0x471   :  { %v552_v31 = vsel %vm239_vm2, %v551_v30, 0.0 }
 0x472   :  { %553 = vadd.xlane.f32.xlu1 %v552_v31 }
 0x4ff   :  { %v554_v33 = vpop.xlane.xlu1 %553 }
 0x500   :  { %v562_v34 = vadd.f32 %v640_v32, %v554_v33 }
 0x502   :  { %v641_v35 = vmul.f32 -1.442695, %v562_v34 }
 0x504   :  { %746 = vpow2.f32 %v641_v35 }
 0x50e   :  { %v747_v36 = vpop.eup %746 }
 0x50f   :  { %v566_v37 = vadd.f32 1.0, %v747_v36 }
 0x511   :  { %748 = vrcp.f32 %v566_v37 }
 0x51b   :  { %v749_v38 = vpop.eup %748 }
 0x51c   :  { %570 = vst.msk [vmem:[%s951_s9] sm:$0xff] %vm569_vm3, %v749_v38 }

</bundles_post_ra>
